<compile_context>
chip_gen: v6e
topology: v6e:2x2x1
jax: 0.10.0
libtpu: 0.0.40
codegen_flags: <defaults>
</compile_context>

<pallas_src>
import functools
import math
import numpy as np

import jax
import jax.numpy as jnp
from jax.experimental import pallas as pl
from jax.experimental.pallas import tpu as pltpu


# ---------------------- glue: per-axis operator matrices ----------------------

def _adaptive_avg_pool_matrix(out_size: int, in_size: int) -> np.ndarray:
    """P[i, :] averages input positions [floor(i*L/out), ceil((i+1)*L/out)),
    exactly matching nn.AdaptiveAvgPool2d's per-axis rule."""
    P = np.zeros((out_size, in_size), dtype=np.float32)
    for i in range(out_size):
        start = (i * in_size) // out_size
        end = ((i + 1) * in_size + out_size - 1) // out_size
        P[i, start:end] = 1.0 / float(end - start)
    return P


def _bilinear_matrix_align_corners(out_size: int, in_size: int) -> np.ndarray:
    """U[h, :] gives the bilinear (align_corners=True) weights along one axis."""
    U = np.zeros((out_size, in_size), dtype=np.float32)
    for h in range(out_size):
        if in_size == 1:
            U[h, 0] = 1.0
            continue
        pos = 0.0 if out_size == 1 else h * (in_size - 1) / (out_size - 1)
        i0 = min(max(int(math.floor(pos)), 0), in_size - 1)
        i1 = min(i0 + 1, in_size - 1)
        frac = pos - i0
        U[h, i0] += 1.0 - frac
        U[h, i1] += frac
    return U


def _round_up(v: int, m: int) -> int:
    return ((v + m - 1) // m) * m


# ------------------------- fused operator construction ------------------------

def _build_fused_operators(params, bins, C, H, W, hw_p):
    """Pack every pyramid branch into dense fused operators (host-side glue).

    Returns:
      qt     : (HW_P, B2P) bf16  concatenated adaptive-avg-pool operators (T)
      wb     : (RT, C)     bf16  stacked 1x1-conv weights, BN scale folded in
      bias_m : (RT, B2P)   f32   BN bias per branch row-block in its column
                                 slice, -1e30 elsewhere (ReLU masks it)
      kb     : (B2P, HW_P) bf16  stacked bilinear-upsample operators (T)
    with RT = len(bins)*R and B2P = sum(b^2) rounded up to 128 lanes.
    HW rows/columns beyond H*W (lane padding) are zero.
    """
    R = params[0]["w"].shape[0]
    RT = len(bins) * R
    HW = H * W
    B2 = sum(b * b for b in bins)
    B2P = max(128, _round_up(B2, 128))               # lane-dense pooled width

    qt = np.zeros((hw_p, B2P), np.float32)
    kb = np.zeros((B2P, hw_p), np.float32)
    wb = np.zeros((RT, C), np.float32)
    bias_m = np.full((RT, B2P), -1e30, np.float32)   # keep f32 (not bf16!)

    off = 0
    for i, b in enumerate(bins):
        b2 = b * b
        Ph = _adaptive_avg_pool_matrix(b, H)
        Pw = _adaptive_avg_pool_matrix(b, W)
        Uh = _bilinear_matrix_align_corners(H, b)
        Uw = _bilinear_matrix_align_corners(W, b)
        Q = np.kron(Ph, Pw)                          # (b2, HW) adaptive pool
        K = np.kron(Uh, Uw)                          # (HW, b2) bilinear up
        qt[:HW, off:off + b2] = Q.T
        kb[off:off + b2, :HW] = K.T
        w_i = np.asarray(params[i]["w"], np.float32)          # (R, C)
        scale_i = np.asarray(params[i]["scale"], np.float32)  # (R,)
        bias_i = np.asarray(params[i]["bias"], np.float32)    # (R,)
        wb[i * R:(i + 1) * R, :] = scale_i[:, None] * w_i     # fold BN scale
        bias_m[i * R:(i + 1) * R, off:off + b2] = bias_i[:, None]
        off += b2

    return (jnp.asarray(qt, jnp.bfloat16),
            jnp.asarray(wb, jnp.bfloat16),
            jnp.asarray(bias_m, jnp.float32),
            jnp.asarray(kb, jnp.bfloat16))


# ------------------------------ Pallas kernel ---------------------------------

def _ppm_fused_kernel(x_ref, qt_ref, w_ref, bias_ref, k_ref, o_ref, y_acc,
                      *, hw_tile):
    # x_ref : (Ct, HW_P) bf16   | qt : (HW_P, B2P) bf16 | w : (RT, Ct) bf16
    # bias  : (RT, B2P)  f32    | k  : (B2P, HW_P) bf16 | o : (RT, HW_P)
    # y_acc : (RT, B2P)  f32 VMEM scratch (accumulates over the C grid axis)
    c_step = pl.program_id(1)

    @pl.when(c_step == 0)
    def _init():
        y_acc[...] = jnp.zeros_like(y_acc)

    # AdaptiveAvgPool2d of ALL bins for this C tile in one matmul
    pooled = jnp.dot(x_ref[...], qt_ref[...],
                     preferred_element_type=jnp.float32)          # (Ct, B2P)
    # partial stacked 1x1 convs (BN scale pre-folded); accumulate over C tiles
    y_acc[...] += jnp.dot(w_ref[...], pooled.astype(jnp.bfloat16),
                          preferred_element_type=jnp.float32)     # (RT, B2P)

    @pl.when(c_step == pl.num_programs(1) - 1)
    def _finalize():
        # BN bias + ReLU; -1e30 bias zeroes cross-branch / pad columns
        z = jnp.maximum(y_acc[...] + bias_ref[...], 0.0).astype(jnp.bfloat16)
        # bilinear upsample (align_corners=True) of all branches, tiled over
        # HW so no (RT, HW_P) f32 temp is materialized; static slices are
        # zero-cost views and stores stay 128-lane aligned.
        n_hw = k_ref.shape[1] // hw_tile
        for t in range(n_hw):
            sl = slice(t * hw_tile, (t + 1) * hw_tile)
            up = jnp.dot(z, k_ref[:, sl],
                         preferred_element_type=jnp.float32)      # (RT, tile)
            o_ref[:, sl] = up.astype(o_ref.dtype)


# --------------------------------- wrapper -------------------------------------

def _pick_vmem_limit_bytes() -> int:
    """~7/8 of physical per-core VMEM (capped at 112 MiB); safe fallback."""
    try:
        cap = int(pltpu.get_tpu_info().vmem_capacity_bytes)
        return min((cap * 7) // 8, 112 * 1024 * 1024)
    except Exception:
        return 48 * 1024 * 1024


def _invariant_spec(shape):
    """Grid-invariant operand: fetched once; single-buffered when supported."""
    index_map = lambda n, c: (0, 0)
    try:
        return pl.BlockSpec(shape, index_map, pipeline_mode=pl.Buffered(1))
    except Exception:  # pipeline_mode is experimental; degrade gracefully
        return pl.BlockSpec(shape, index_map)


def ppm_forward(x, params, bins):
    """x: (N, C, H, W).  Returns (N, C + len(bins)*R, H, W), same dtype as x."""
    N, C, H, W = x.shape
    HW = H * W
    HW_P = _round_up(HW, 128)                 # lane-dense store width
    R = params[0]["w"].shape[0]
    RT = len(bins) * R

    qt, wb, bias_m, kb = _build_fused_operators(params, bins, C, H, W, HW_P)
    B2P = qt.shape[1]

    # C tile: a 128-multiple (MXU / layout friendly) or the full C when small.
    ct = C
    for cand in (512, 256, 128):
        if C > cand and C % cand == 0:
            ct = cand
            break
    n_c = C // ct

    # HW tile for the in-kernel upsample/store loop (largest 128-multiple).
    hw_t = 128
    for cand in (1024, 512, 256, 128):
        if HW_P % cand == 0:
            hw_t = cand
            break

    # Stream x to the kernel in bf16 (halves the dominant HBM read stream);
    # the original-precision x is used for the passthrough concat below.
    x_flat = x.reshape(N, C, HW)
    if HW_P != HW:
        x_flat = jnp.pad(x_flat, ((0, 0), (0, 0), (0, HW_P - HW)))
    x_k = x_flat if x_flat.dtype == jnp.bfloat16 else x_flat.astype(jnp.bfloat16)

    flops = int(2 * N * (C * HW_P * B2P + RT * C * B2P + RT * B2P * HW_P))
    bytes_accessed = int(x_k.size * 2
                         + 2 * (qt.size + wb.size * n_c + kb.size)
                         + 4 * bias_m.size
                         + N * RT * HW_P * x.dtype.itemsize)

    pyr = pl.pallas_call(
        functools.partial(_ppm_fused_kernel, hw_tile=hw_t),
        out_shape=jax.ShapeDtypeStruct((N, RT, HW_P), x.dtype),
        grid_spec=pltpu.PrefetchScalarGridSpec(
            num_scalar_prefetch=0,
            grid=(N, n_c),
            in_specs=[
                pl.BlockSpec((pl.Squeezed(), ct, HW_P),
                             lambda n, c: (n, c, 0)),          # x (bf16, C-tiled)
                _invariant_spec((HW_P, B2P)),                  # qt (pool op)
                pl.BlockSpec((RT, ct), lambda n, c: (0, c)),   # w  (C-tiled)
                _invariant_spec((RT, B2P)),                    # masked BN bias
                _invariant_spec((B2P, HW_P)),                  # k (upsample op)
            ],
            out_specs=pl.BlockSpec((pl.Squeezed(), RT, HW_P),
                                   lambda n, c: (n, 0, 0)),
            scratch_shapes=[pltpu.VMEM((RT, B2P), jnp.float32)],
        ),
        compiler_params=pltpu.CompilerParams(
            dimension_semantics=("parallel", "arbitrary"),
            vmem_limit_bytes=_pick_vmem_limit_bytes(),
        ),
        cost_estimate=pl.CostEstimate(flops=flops, transcendentals=0,
                                      bytes_accessed=bytes_accessed),
    )(x_k, qt, wb, bias_m, kb)

    pyr = pyr[:, :, :HW].reshape(N, RT, H, W)
    # Passthrough concat at XLA level (runs at full HBM bandwidth; keeps the
    # kernel's output block half the size and the passthrough bit-exact).
    return jnp.concatenate([x, pyr], axis=1)


# ----------------------------- parameters & ref --------------------------------

def init_ppm_params(key, in_dim, reduction_dim, bins):
    """Deterministic synthetic parameters (conv weight + folded inference BN)."""
    params = []
    eps = 1e-5
    for i, _ in enumerate(bins):
        k_w, k_g, k_b = jax.random.split(jax.random.fold_in(key, i), 3)
        bound = 1.0 / math.sqrt(in_dim)  # PyTorch Conv2d default init (1x1 kernel)
        w = jax.random.uniform(k_w, (reduction_dim, in_dim), jnp.float32, -bound, bound)
        gamma = 1.0 + 0.1 * jax.random.normal(k_g, (reduction_dim,), jnp.float32)
        beta = 0.1 * jax.random.normal(k_b, (reduction_dim,), jnp.float32)
        running_mean = jnp.zeros((reduction_dim,), jnp.float32)
        running_var = jnp.ones((reduction_dim,), jnp.float32)
        scale = gamma / jnp.sqrt(running_var + eps)
        bias = beta - running_mean * scale
        params.append(dict(w=w, scale=scale, bias=bias))
    return params


def _ppm_reference(x, params, bins):
    """Pure-jnp f32 per-branch reference of the module semantics."""
    N, C, H, W = x.shape
    x_flat = x.reshape(N, C, H * W)
    outs = [x]
    for p, b in zip(params, bins):
        Q = jnp.asarray(np.kron(_adaptive_avg_pool_matrix(b, H),
                                _adaptive_avg_pool_matrix(b, W)))
        K = jnp.asarray(np.kron(_bilinear_matrix_align_corners(H, b),
                                _bilinear_matrix_align_corners(W, b)))
        pooled = jnp.einsum('ncp,bp->ncb', x_flat, Q)
        y = jnp.einsum('rc,ncb->nrb', p["w"], pooled)
        z = jnp.maximum(y * p["scale"][None, :, None] + p["bias"][None, :, None], 0.0)
        up = jnp.einsum('nrb,pb->nrp', z, K)
        outs.append(up.reshape(N, -1, H, W))
    return jnp.concatenate(outs, axis=1)


if __name__ == "__main__":
    key = jax.random.PRNGKey(0)
    in_dim, reduction_dim = 8, 2
    bins = (1, 2, 3, 6)
    N, H, W = 2, 16, 16

    kx, kp = jax.random.split(key)
    x = jax.random.normal(kx, (N, in_dim, H, W), jnp.float32)
    params = init_ppm_params(kp, in_dim, reduction_dim, bins)

    out = ppm_forward(x, params, bins)
    out = jax.block_until_ready(out)

    expected_channels = in_dim + reduction_dim * len(bins)
    assert out.shape == (N, expected_channels, H, W), out.shape

    # passthrough channels must be bit-exact copies of x
    np.testing.assert_array_equal(np.asarray(out[:, :in_dim]), np.asarray(x))

    # pyramid channels vs f32 reference (tolerance covers bf16 MXU operands)
    ref = _ppm_reference(x, params, bins)
    np.testing.assert_allclose(np.asarray(out), np.asarray(ref), rtol=2e-2, atol=2e-2)

    print("KERNEL_OK")
</pallas_src>

<mosaic_0001>
module attributes {stable_mosaic.version = 11 : i64} {
  func.func @_ppm_fused_kernel(%arg0: i32, %arg1: i32, %arg2: memref<1x8x256xbf16, #tpu.memory_space<vmem>>, %arg3: memref<256x128xbf16, #tpu.memory_space<vmem>>, %arg4: memref<8x8xbf16, #tpu.memory_space<vmem>>, %arg5: memref<8x128xf32, #tpu.memory_space<vmem>>, %arg6: memref<128x256xbf16, #tpu.memory_space<vmem>>, %arg7: memref<1x8x256xf32, #tpu.memory_space<vmem>>, %arg8: memref<8x128xf32, #tpu.memory_space<vmem>>) attributes {dimension_semantics = [#tpu.dimension_semantics<parallel>, #tpu.dimension_semantics<arbitrary>], iteration_bounds = array<i64: 2, 1>, scalar_prefetch = 0 : i64, scratch_operands = 1 : i64, tpu.core_type = #tpu.core_type<tc>, window_params = [{transform_indices = @transform_0, window_bounds = array<i64: 1, 8, 256>}, {pipeline_mode = #tpu.pipeline_mode<synchronous>, transform_indices = @transform_1, window_bounds = array<i64: 256, 128>}, {transform_indices = @transform_2, window_bounds = array<i64: 8, 8>}, {pipeline_mode = #tpu.pipeline_mode<synchronous>, transform_indices = @transform_3, window_bounds = array<i64: 8, 128>}, {pipeline_mode = #tpu.pipeline_mode<synchronous>, transform_indices = @transform_4, window_bounds = array<i64: 128, 256>}, {transform_indices = @transform_5, window_bounds = array<i64: 1, 8, 256>}]} {
    %c0_i32 = arith.constant 0 : i32
    %0 = arith.cmpi eq, %arg1, %c0_i32 : i32
    %1 = arith.extui %0 : i1 to i32
    %c0_i32_0 = arith.constant 0 : i32
    %2 = arith.cmpi ne, %1, %c0_i32_0 : i32
    scf.if %2 {
      %cst_14 = arith.constant 0.000000e+00 : f32
      %16 = vector.broadcast %cst_14 : f32 to vector<8x128xf32>
      %c0_15 = arith.constant 0 : index
      %c0_16 = arith.constant 0 : index
      %17 = vector.load %arg8[%c0_15, %c0_16] : memref<8x128xf32, #tpu.memory_space<vmem>>, vector<8x128xf32>
      tpu.vector_store %arg8[%c0_15, %c0_16], %16 {strides = array<i32>} : memref<8x128xf32, #tpu.memory_space<vmem>>, vector<8x128xf32>,
    } else {
    }
    %c0 = arith.constant 0 : index
    %c0_1 = arith.constant 0 : index
    %c0_2 = arith.constant 0 : index
    %3 = vector.load %arg2[%c0, %c0_1, %c0_2] : memref<1x8x256xbf16, #tpu.memory_space<vmem>>, vector<1x8x256xbf16>
    %4 = vector.shape_cast %3 : vector<1x8x256xbf16> to vector<8x256xbf16>
    %c0_3 = arith.constant 0 : index
    %c0_4 = arith.constant 0 : index
    %5 = vector.load %arg3[%c0_3, %c0_4] : memref<256x128xbf16, #tpu.memory_space<vmem>>, vector<256x128xbf16>
    %cst = arith.constant dense<0.000000e+00> : vector<8x128xf32>
    %6 = tpu.matmul %4, %5, %cst {dimension_numbers = #tpu.dot_dimension_numbers<[1], [0], [0], [1], [0, 0, 1, 1], [], []>} : vector<8x256xbf16>, vector<256x128xbf16>, vector<8x128xf32> -> vector<8x128xf32>
    %c0_5 = arith.constant 0 : index
    %c0_6 = arith.constant 0 : index
    %7 = vector.load %arg8[%c0_5, %c0_6] : memref<8x128xf32, #tpu.memory_space<vmem>>, vector<8x128xf32>
    %c0_7 = arith.constant 0 : index
    %c0_8 = arith.constant 0 : index
    %8 = vector.load %arg4[%c0_7, %c0_8] : memref<8x8xbf16, #tpu.memory_space<vmem>>, vector<8x8xbf16>
    %9 = arith.truncf %6 : vector<8x128xf32> to vector<8x128xbf16>
    %cst_9 = arith.constant dense<0.000000e+00> : vector<8x128xf32>
    %10 = tpu.matmul %8, %9, %cst_9 {dimension_numbers = #tpu.dot_dimension_numbers<[1], [0], [0], [1], [0, 0, 1, 1], [], []>} : vector<8x8xbf16>, vector<8x128xbf16>, vector<8x128xf32> -> vector<8x128xf32>
    %11 = arith.addf %7, %10 : vector<8x128xf32>
    %c0_10 = arith.constant 0 : index
    %c0_11 = arith.constant 0 : index
    %12 = vector.load %arg8[%c0_10, %c0_11] : memref<8x128xf32, #tpu.memory_space<vmem>>, vector<8x128xf32>
    tpu.vector_store %arg8[%c0_10, %c0_11], %11 {strides = array<i32>} : memref<8x128xf32, #tpu.memory_space<vmem>>, vector<8x128xf32>,
    %c0_i32_12 = arith.constant 0 : i32
    %13 = arith.cmpi eq, %arg1, %c0_i32_12 : i32
    %14 = arith.extui %13 : i1 to i32
    %c0_i32_13 = arith.constant 0 : i32
    %15 = arith.cmpi ne, %14, %c0_i32_13 : i32
    scf.if %15 {
      %c0_14 = arith.constant 0 : index
      %c0_15 = arith.constant 0 : index
      %16 = vector.load %arg8[%c0_14, %c0_15] : memref<8x128xf32, #tpu.memory_space<vmem>>, vector<8x128xf32>
      %c0_16 = arith.constant 0 : index
      %c0_17 = arith.constant 0 : index
      %17 = vector.load %arg5[%c0_16, %c0_17] : memref<8x128xf32, #tpu.memory_space<vmem>>, vector<8x128xf32>
      %18 = arith.addf %16, %17 : vector<8x128xf32>
      %cst_18 = arith.constant 0.000000e+00 : f32
      %19 = vector.broadcast %cst_18 : f32 to vector<8x128xf32>
      %20 = arith.maximumf %18, %19 : vector<8x128xf32>
      %21 = arith.truncf %20 : vector<8x128xf32> to vector<8x128xbf16>
      %c0_19 = arith.constant 0 : index
      %c0_20 = arith.constant 0 : index
      %22 = vector.load %arg6[%c0_19, %c0_20] : memref<128x256xbf16, #tpu.memory_space<vmem>>, vector<128x256xbf16>
      %cst_21 = arith.constant dense<0.000000e+00> : vector<8x256xf32>
      %23 = tpu.matmul %21, %22, %cst_21 {dimension_numbers = #tpu.dot_dimension_numbers<[1], [0], [0], [1], [0, 0, 1, 1], [], []>} : vector<8x128xbf16>, vector<128x256xbf16>, vector<8x256xf32> -> vector<8x256xf32>
      %c0_22 = arith.constant 0 : index
      %c0_23 = arith.constant 0 : index
      %c0_24 = arith.constant 0 : index
      %24 = vector.load %arg7[%c0_22, %c0_23, %c0_24] : memref<1x8x256xf32, #tpu.memory_space<vmem>>, vector<1x8x256xf32>
      %25 = vector.shape_cast %24 : vector<1x8x256xf32> to vector<8x256xf32>
      %26 = vector.shape_cast %23 : vector<8x256xf32> to vector<1x8x256xf32>
      tpu.vector_store %arg7[%c0_22, %c0_23, %c0_24], %26 {strides = array<i32>} : memref<1x8x256xf32, #tpu.memory_space<vmem>>, vector<1x8x256xf32>,
    } else {
    }
    return
  }
  func.func @transform_0(%arg0: i32, %arg1: i32) -> (i32, i32, i32) {
    %c0_i32 = arith.constant 0 : i32
    %c0_i32_0 = arith.constant 0 : i32
    return %arg0, %arg1, %c0_i32 : i32, i32, i32
  }
  func.func @transform_1(%arg0: i32, %arg1: i32) -> (i32, i32) {
    %c0_i32 = arith.constant 0 : i32
    %c0_i32_0 = arith.constant 0 : i32
    %c0_i32_1 = arith.constant 0 : i32
    return %c0_i32, %c0_i32_0 : i32, i32
  }
  func.func @transform_2(%arg0: i32, %arg1: i32) -> (i32, i32) {
    %c0_i32 = arith.constant 0 : i32
    %c0_i32_0 = arith.constant 0 : i32
    return %c0_i32, %arg1 : i32, i32
  }
  func.func @transform_3(%arg0: i32, %arg1: i32) -> (i32, i32) {
    %c0_i32 = arith.constant 0 : i32
    %c0_i32_0 = arith.constant 0 : i32
    %c0_i32_1 = arith.constant 0 : i32
    return %c0_i32, %c0_i32_0 : i32, i32
  }
  func.func @transform_4(%arg0: i32, %arg1: i32) -> (i32, i32) {
    %c0_i32 = arith.constant 0 : i32
    %c0_i32_0 = arith.constant 0 : i32
    %c0_i32_1 = arith.constant 0 : i32
    return %c0_i32, %c0_i32_0 : i32, i32
  }
  func.func @transform_5(%arg0: i32, %arg1: i32) -> (i32, i32, i32) {
    %c0_i32 = arith.constant 0 : i32
    %c0_i32_0 = arith.constant 0 : i32
    %c0_i32_1 = arith.constant 0 : i32
    return %arg0, %c0_i32, %c0_i32_0 : i32, i32, i32
  }
}

</mosaic_0001>

<bundles_post_ra>
// kernel: tpu_custom_call.1
= control target key start
LH: loop header
LB: loop body
LE: loop exit
PB: predicated region body
PF: predicated region fallthrough
CT: control target
= control target key end

     0   :  { %s1552_s0 = inlined_call_operand.hbm [shape: bf16[2,8,256], index: 0, kind: input, shape index: {}]   ;;  %s1553_s1 = inlined_call_operand.hbm [shape: bf16[256,128], index: 1, kind: input, shape index: {}]   ;;  %s1554_s2 = inlined_call_operand.hbm [shape: bf16[8,8], index: 2, kind: input, shape index: {}]   ;;  %s1555_s3 = inlined_call_operand.hbm [shape: f32[8,128], index: 3, kind: input, shape index: {}]   ;;  %s1556_s4 = inlined_call_operand.hbm [shape: bf16[128,256], index: 4, kind: input, shape index: {}]   ;;  %s1557_s5 = inlined_call_operand.hbm [shape: f32[2,8,256], index: 5, kind: output, shape index: {}]  }
   0x1   :  { %1559 = sst [smem:[#allocation17_spill]] %s1553_s1 }
   0x2   :  { %1560 = sst [smem:[#allocation18_spill]] %s1554_s2 }
   0x3   :  { %10 = vsyncpa [#allocation4], 0 }
   0x4   :  { %12 = vsyncpa [#allocation4 + $0x1], 0 }
   0x5   :  { %13 = vsyncpa [#allocation7], 0 }
   0x6   :  { %14 = vsyncpa [#allocation10], 0 }
   0x7   :  { %15 = vsyncpa [#allocation5], 0 }
   0x8   :  { %17 = vsyncpa [#allocation5 + $0x1], 0  ;;  %s1343_s18 = smov 0   ;;  %s1345_s19 = smov 0  }
   0x9   :  { %s1347_s20 = smov 0   ;;  %s1349_s21 = smov 0  }
   0xa   :  { %s1351_s22 = smov 0   ;;  %s1353_s23 = smov 0  }
   0xb LB: > { %s836_s24 = sadd.s32 4294967295, %s1298_s23   ;;  %p838_p0 = scmp.ge.s32.totalorder %s1298_s23, 1  ;;  %s1298_s23 = sphi %s1353_s23, %s23_s23   ;;  %s1294_s22 = sphi %s1351_s22, %s1577_s22   ;;  %s1290_s21 = sphi %s1349_s21, %s1576_s21   ;;  %s1286_s20 = sphi %s1347_s20, %s1575_s20   ;;  %s1282_s19 = sphi %s1345_s19, %s1574_s19   ;;  %s1278_s18 = sphi %s1343_s18, %s1573_s18  }
   0xc   : > { %p1377_p1 = scmp.eq.s32.totalorder %s836_s24, 0  ;;  %p183_p2 = scmp.lt.s32.totalorder %s1298_s23, 3 }
   0xd   : > { %s1300_s27 = smov [#allocation6]   ;;  %s1301_s30 = smov [#allocation9]  }
   0xe   : > { %p1382_p3 = pnand %p838_p0, %p183_p2  ;;  %s195_s28 = sshll.u32 %s1300_s27, 4  ;;  %s196_s28 = int_to_ptr.vmem [resolvable:$true] %s195_s28 }
   0xf   : > { %s222_s6 = sshll.u32 %s1301_s30, 4  ;;  %s1302_s7 = smov [#allocation8]   ;;  %s223_s6 = int_to_ptr.vmem [resolvable:$true] %s222_s6 }
  0x10   : > { %s1562_s26 = scalar_select %p1382_p3, 1, 0 }
  0x11   : > { %p946_p4 = pneg %p1382_p3  ;;  %s211_s8 = sshll.u32 %s1302_s7, 4  ;;  %s212_s8 = int_to_ptr.vmem [resolvable:$true] %s211_s8 }
  0x12   : > { %s1089_s9 = scalar_lea.vmem %s196_s28, 2048  ;;  %p1097_p11 = scmp.lt.s32.totalorder %s196_s28, %s196_s28 }
  0x13   : > { %p1391_p6 = pnand %p946_p4, %p1377_p1  ;;  %p1090_p8 = scmp.ne.s32.totalorder %s196_s28, %s1089_s9 }
  0x14   : > { %p1098_p12 = scmp.lt.s32.totalorder %s1089_s9, %s1089_s9 }
  0x15   : > { %p1080_p7 = pneg %p1391_p6 }
  0x16   : > { %p1099_p13 = por %p1098_p12, %p1097_p11 }
  0x17   : > { %p1092_p9 = pnand %p1090_p8, %p1080_p7 }
  0x19   : > { %p1093_p10 = pneg %p1092_p9 }
  0x1b   : > { %p1100_p0 = pnand %p1099_p13, %p1093_p10 }
  0x1d   : > { %1103 = shalt.err (!%p1100_p0)
}
  0x1e   : > { %s1303_s10 = smov 64   ;;  %s1304_s11 = smov 4  }
  0x1f   : > { %s1564_s1 = sld [smem:[#allocation17_spill]]  ;;  %s1115_s14 = scalar_lea.vmem %s223_s6, 128 }
  0x20   : > { %p1116_p2 = scmp.ne.s32.totalorder %s223_s6, %s1115_s14  ;;  %p1123_p9 = scmp.lt.s32.totalorder %s223_s6, %s223_s6 }
  0x21   : > { %p1124_p5 = scmp.lt.s32.totalorder %s1115_s14, %s1115_s14 }
  0x22   : > { %p1118_p4 = pnand %p1116_p2, %p1080_p7 }
  0x23   : > { %p1125_p11 = por %p1124_p5, %p1123_p9 }
  0x24   : > { %p1119_p8 = pneg %p1118_p4 }
  0x25   : > { %949 = dma.hbm_to_vmem [thread:$0]  (!%p1391_p6), %s1564_s1, 2048, %s196_s28, [#allocation7], %s1303_s10, %s1303_s10, %s1304_s11  }
  0x26   : > { %p1126_p10 = pnand %p1125_p11, %p1119_p8 }
  0x28   : > { %1129 = shalt.err (!%p1126_p10)
}
  0x29   : > { %955 = dma.hbm_to_vmem [thread:$0]  (!%p1391_p6), %s1555_s3, 128, %s223_s6, [#allocation10]  }
  0x2a   : > { %s1141_s17 = scalar_lea.vmem %s212_s8, 64  ;;  %p1149_p2 = scmp.lt.s32.totalorder %s212_s8, %s212_s8 }
  0x2b   : > { %p1142_p12 = scmp.ne.s32.totalorder %s212_s8, %s1141_s17  ;;  %p1150_p4 = scmp.lt.s32.totalorder %s1141_s17, %s1141_s17 }
  0x2d   : > { %p1144_p13 = pnand %p1142_p12, %p1080_p7  ;;  %p1151_p3 = por %p1150_p4, %p1149_p2 }
  0x2f   : > { %p1145_p0 = pneg %p1144_p13 }
  0x31   : > { %p1152_p5 = pnand %p1151_p3, %p1145_p0 }
  0x33   : > { %1155 = shalt.err (!%p1152_p5)
}
  0x34   : > { %s1565_s2 = sld [smem:[#allocation18_spill]]  ;;  %s1305_s30 = smov [#allocation11]  }
  0x35   : > { %s232_s6 = sshll.u32 %s1305_s30, 4  ;;  %s233_s6 = int_to_ptr.vmem [resolvable:$true] %s232_s6 }
  0x36   : > { %s1167_s7 = scalar_lea.vmem %s233_s6, 2048  ;;  %p1175_p10 = scmp.lt.s32.totalorder %s233_s6, %s233_s6 }
  0x37   : > { %p1168_p8 = scmp.ne.s32.totalorder %s233_s6, %s1167_s7  ;;  %p1176_p12 = scmp.lt.s32.totalorder %s1167_s7, %s1167_s7 }
  0x39   : > { %p1170_p9 = pnand %p1168_p8, %p1080_p7  ;;  %p1177_p3 = por %p1176_p12, %p1175_p10 }
  0x3a   : > { %952 = dma.hbm_to_vmem [thread:$0]  (!%p1391_p6), %s1565_s2, 64, %s212_s8, [#allocation7]  }
  0x3b   : > { %p1171_p11 = pneg %p1170_p9 }
  0x3d   : > { %p1178_p13 = pnand %p1177_p3, %p1171_p11 }
  0x3f   : > { %1181 = shalt.err (!%p1178_p13)
}
  0x40   : > { %s1306_s9 = smov 128   ;;  %s1307_s8 = smov 8  }
  0x41   : > { %958 = dma.hbm_to_vmem [thread:$0]  (!%p1391_p6), %s1556_s4, 2048, %s233_s6, [#allocation10], %s1306_s9, %s1306_s9, %s1307_s8  }
  0x42   : > { %s837_s12 = sadd.s32 4294967294, %s1298_s23   ;;  %s35_s13 = sadd.s32 1, %s1294_s22 }
  0x43   : > { %p37_p7 = scmp.ge.s32.totalorder %s35_s13, 2  ;;  %s44_s14 = sadd.s32 1, %s1286_s20 }
  0x44   : > { %p51_p0 = scmp.ne.s32.totalorder %s1286_s20, %s1282_s19  ;;  %p52_p2 = scmp.eq.s32.totalorder %s1298_s23, 0 }
  0x45   : > { %s1579_s13 = smov (%p37_p7, %s35_s13), 0  ;;  %p57_p5 = scmp.ne.s32.totalorder %s1282_s19, %s1278_s18 }
  0x46   : > { %p1437_p4 = por %p52_p2, %p51_p0  ;;  %s39_s29 = ssub.s32 %s1294_s22, %s1579_s13 }
  0x47   : > { %p170_p6 = scmp.eq.s32.totalorder %s836_s24, 1  ;;  %p42_p8 = scmp.eq.s32.totalorder %s39_s29, 0 }
  0x48   : > { %p1449_p9 = por %p1377_p1, %p57_p5  ;;  %p176_p10 = scmp.eq.s32.totalorder %s837_s12, 1 }
  0x49   : > { %p1453_p11 = por %p170_p6, %p51_p0  ;;  %p971_p3 = scmp.lt.s32.totalorder %s1298_s23, 2 }
  0x4a   : > { %s1458_s27 = scalar_select %p42_p8, %s1286_s20, %s44_s14  }
  0x4b   : > { %p1460_p12 = por %p176_p10, %p57_p5  ;;  %s246_s30 = sand.u32 1, %s1286_s20  }
  0x4c   : > { %s894_s24 = sshll.u32 %s1294_s22, 7  ;;  %s844_s6 = sshll.u32 %s246_s30, 3 }
  0x4d   : > { %s258_s8 = scalar_lea.hbm %s1552_s0, %s894_s24  ;;  %s250_s10 = scalar_lea.vmem [#allocation3], %s844_s6 }
  0x4e   : > { %s260_s11 = sshll.u32 %s250_s10, 4  ;;  %p1472_p13 = pnand %p971_p3, %p1437_p4  ;;  %s261_s11 = int_to_ptr.vmem [resolvable:$true] %s260_s11 }
  0x4f   : > { %s247_s12 = scalar_lea.sflag [#allocation4], %s246_s30  ;;  %s1195_s14 = scalar_lea.vmem %s261_s11, 128 }
  0x50   : > { %p1184_p7 = pneg %p1472_p13  ;;  %p1196_p0 = scmp.ne.s32.totalorder %s261_s11, %s1195_s14 }
  0x51   : > { %s1308_s1 = smov [#allocation3]  }
  0x52   : > { %p1198_p2 = pnand %p1196_p0, %p1184_p7  ;;  %s1200_s2 = sshll.u32 %s1308_s1, 4  ;;  %s1201_s2 = int_to_ptr.vmem [resolvable:$false] %s1200_s2 }
  0x53   : > { %s1202_s24 = scalar_lea.vmem %s1201_s2, 256  ;;  %p1203_p6 = scmp.lt.s32.totalorder %s261_s11, %s1201_s2 }
  0x54   : > { %p1199_p5 = pneg %p1198_p2  ;;  %p1204_p8 = scmp.lt.s32.totalorder %s1202_s24, %s1195_s14 }
  0x56   : > { %p1205_p10 = por %p1204_p8, %p1203_p6 }
  0x58   : > { %p1206_p4 = pnand %p1205_p10, %p1199_p5 }
  0x5a   : > { %1209 = shalt.err (!%p1206_p4)
}
  0x5b   : > { %962 = dma.hbm_to_vmem [thread:$0]  (!%p1472_p13), %s258_s8, 128, %s261_s11, %s247_s12  }
  0x5c   : > { %p1571_p3 = scmp.ne.s32.totalorder %s1562_s26, 0 }
  0x5d   : > { %s1483_s15 = sand.u32 (!%p1571_p3), 1, %s1282_s19  }
  0x5e   : > { %269 = sbr.rel (%p1571_p3) target bundleno = 748 (0x2ec), region = 40  ;;  %s848_s1 = sshll.u32 (!%p1571_p3), %s1483_s15, 3 }
  0x5f   : > { %s272_s30 = scalar_lea.sflag (!%p1571_p3), [#allocation4], %s1483_s15  ;;  %s275_s6 = scalar_lea.vmem (!%p1571_p3), [#allocation3], %s848_s1 }
  0x63   : > { %1261 = dma.done.wait (%p1449_p9), %s272_s30, 128  }
  0x64   : > { %1263 = vsyncadd (%p1449_p9), %s272_s30, 4294967168 }
  0x65   : > { %1265 = dma.done.wait (%p1377_p1), [#allocation7], 2112  }
  0x66   : > { %1267 = vsyncadd (%p1377_p1), [#allocation7], 4294965184 }
  0x67   : > { %1269 = dma.done.wait (%p1377_p1), [#allocation10], 2176  }
  0x68   : > { %1271 = vsyncadd (%p1377_p1), [#allocation10], 4294965120  ;;  %v1036_v0 = vld [vmem:[#allocation6 + $0x78] sm:$0xff]   ;;  %v1038_v2 = vld [vmem:[#allocation6 + $0x70] sm:$0xff]   ;;  %v1309_v19 = vmov 0.0   ;;  %vm1310_vm0 = vmmov 0  }
  0x69   : > { %v1037_v1 = vld [vmem:[#allocation6 + $0x38] sm:$0xff]   ;;  %896 = vmatprep.subr.bf16.mxu0 %v1036_v0  ;;  %v1039_v3 = vld [vmem:[#allocation6 + $0x30] sm:$0xff]   ;;  %v1040_v4 = vld [vmem:[#allocation6 + $0x68] sm:$0xff]   ;;  %920 = vmatprep.subr.bf16.mxu1 %v1309_v19  ;;  %vm507_vm1 = vcmask 1043456   ;;  %vm503_vm2 = vcmask 64512   ;;  %v1311_v44 = vmov 0  }
  0x6a   : > { %897 = vmatpush3.bf16.msra.mxu0 %v1037_v1  ;;  %v1041_v5 = vld [vmem:[#allocation6 + $0x28] sm:$0xff]   ;;  %v1042_v6 = vld [vmem:[#allocation6 + $0x60] sm:$0xff]   ;;  %v1044_v8 = vld [vmem:[#allocation6 + $0x58] sm:$0xff]   ;;  %922 = vmatprep.mubr.msk.bf16.mxu1 %vm1310_vm0, %v1309_v19  ;;  %s853_s2 = sshll.u32 %s1483_s15, 4  ;;  %s895_s16 = sshll.u32 %s1290_s21, 8 }
  0x6b   : > { %898 = vmatprep.subr.bf16.mxu0 %v1038_v2  ;;  %v1043_v7 = vld [vmem:[#allocation6 + $0x20] sm:$0xff]   ;;  %v1045_v9 = vld [vmem:[#allocation6 + $0x18] sm:$0xff]   ;;  %v1046_v10 = vld [vmem:[#allocation6 + $0x50] sm:$0xff]   ;;  %s317_s25 = scalar_lea.vmem [#allocation12], %s853_s2  ;;  %s1506_s8 = scalar_lea.hbm %s1557_s5, %s895_s16 }
  0x6c   : > { %v324_v11 = vld [vmem:[%s275_s6] sm:$0xff]  ;;  %v1048_v14 = vld [vmem:[#allocation6 + $0x48] sm:$0xff]   ;;  %v1050_v16 = vld [vmem:[#allocation6 + $0x40] sm:$0xff]   ;;  %s715_s26 = sshll.u32 %s317_s25, 4  ;;  %s701_s10 = scalar_lea.sflag [#allocation5], %s1483_s15  ;;  %s1501_s26 = int_to_ptr.vmem [resolvable:$true] %s715_s26 }
  0x6d   : > { %v1047_v12 = vld [vmem:[#allocation6 + $0x10] sm:$0xff]   ;;  %v855_v13 = vcombine.high %v324_v11, %v324_v11  ;;  %v1049_v15 = vld [vmem:[#allocation6 + $0x8] sm:$0xff]   ;;  %v1051_v17 = vld [vmem:[#allocation6] sm:$0xff]   ;;  %v854_v18 = vcombine.low %v324_v11, %v324_v11  ;;  %s1210_s11 = scalar_lea.vmem %s1501_s26, 256  ;;  %s1312_s21 = smov [#allocation12]  }
  0x6e   : > { %899 = vmatpush3.bf16.msra.mxu0 %v1039_v3  ;;  %v1056_v25 = vld [vmem:[#allocation11 + $0x74] ss:$8 sps:$4 sm:$0xff]   ;;  %v1054_v29 = vld [vmem:[#allocation11 + $0x70] ss:$8 sps:$4 sm:$0xff]   ;;  %v1059_v30 = vld [vmem:[#allocation11 + $0x64] ss:$8 sps:$4 sm:$0xff]   ;;  %p1211_p1 = scmp.ne.s32.totalorder %s1501_s26, %s1210_s11 }
  0x6f   : > { %900 = vmatprep.subr.bf16.mxu0 %v1040_v4  ;;  %492 = vmatprep.mubr.bf16.mxu0 %v855_v13  ;;  %v501_v28 = vld [vmem:[#allocation8] sm:$0xf]  ;;  %v1057_v31 = vld [vmem:[#allocation11 + $0x60] ss:$8 sps:$4 sm:$0xff]   ;;  %v1060_v33 = vld [vmem:[#allocation11 + $0x50] ss:$8 sps:$4 sm:$0xff]  }
  0x70   : > { %v1062_v32 = vld [vmem:[#allocation11 + $0x54] ss:$8 sps:$4 sm:$0xff]   ;;  %v1065_v34 = vld [vmem:[#allocation11 + $0x44] ss:$8 sps:$4 sm:$0xff]   ;;  %v1063_v35 = vld [vmem:[#allocation11 + $0x40] ss:$8 sps:$4 sm:$0xff]   ;;  %p1212_p9 = pnand %p1211_p1, %p1453_p11 }
  0x71   : > { %v1068_v36 = vld [vmem:[#allocation11 + $0x34] ss:$8 sps:$4 sm:$0xff]   ;;  %v1066_v37 = vld [vmem:[#allocation11 + $0x30] ss:$8 sps:$4 sm:$0xff]   ;;  %v1071_v38 = vld [vmem:[#allocation11 + $0x24] ss:$8 sps:$4 sm:$0xff]  }
  0x72   : > { %901 = vmatpush3.bf16.msra.mxu0 %v1041_v5  ;;  %v1069_v39 = vld [vmem:[#allocation11 + $0x20] ss:$8 sps:$4 sm:$0xff]   ;;  %v1074_v40 = vld [vmem:[#allocation11 + $0x14] ss:$8 sps:$4 sm:$0xff]   ;;  %v1072_v41 = vld [vmem:[#allocation11 + $0x10] ss:$8 sps:$4 sm:$0xff]   ;;  %p1213_p13 = pneg %p1212_p9 }
  0x73   : > { %902 = vmatprep.subr.bf16.mxu0 %v1042_v6  ;;  %v1077_v42 = vld [vmem:[#allocation11 + $0x4] ss:$8 sps:$4 sm:$0xff]   ;;  %v1075_v43 = vld [vmem:[#allocation11] ss:$8 sps:$4 sm:$0xff]   ;;  %v557_v45 = vld [vmem:[#allocation9] sm:$0xff]  ;;  %s1214_s29 = sshll.u32 %s1312_s21, 4  ;;  %s1215_s29 = int_to_ptr.vmem [resolvable:$false] %s1214_s29 }
  0x74   : > { %s1216_s12 = scalar_lea.vmem %s1215_s29, 512  ;;  %p1217_p7 = scmp.lt.s32.totalorder %s1501_s26, %s1215_s29 }
  0x75   : > { %p1218_p0 = scmp.lt.s32.totalorder %s1216_s12, %s1210_s11 }
  0x76   : > { %903 = vmatpush3.bf16.msra.mxu0 %v1043_v7 }
  0x77   : > { %904 = vmatprep.subr.bf16.mxu0 %v1044_v8  ;;  %p1219_p2 = por %p1218_p0, %p1217_p7 }
  0x79   : > { %p1220_p5 = pnand %p1219_p2, %p1213_p13 }
  0x7a   : > { %905 = vmatpush3.bf16.msra.mxu0 %v1045_v9 }
  0x7b   : > { %906 = vmatprep.subr.bf16.mxu0 %v1046_v10 }
  0x7e   : > { %907 = vmatpush3.bf16.msra.mxu0 %v1047_v12 }
  0x7f   : > { %908 = vmatprep.subr.bf16.mxu0 %v1048_v14 }
  0x82   : > { %909 = vmatpush3.bf16.msra.mxu0 %v1049_v15 }
  0x83   : > { %910 = vmatprep.subr.bf16.mxu0 %v1050_v16 }
  0x86   : > { %911 = vmatpush3.bf16.msra.mxu0 %v1051_v17 }
  0x89   : > { %493 = vmatmul.mubr.bf16.vlgmr.msra.gmra.mxu0 %v854_v18 }
 0x149   : > { %v912_v20 = vpop.f32.mrf.mxu0 }
 0x14b   : > { %v913_v21 = vpop.f32.mrf.mxu0 }
 0x14c   : > { %v914_v22 = vadd.f32 %v913_v21, %v912_v20 }
 0x14d   : > { %v915_v23 = vpop.f32.mrf.mxu0 }
 0x14e   : > { %v502_v24 = vpack.c.bf16 %v914_v22, %v914_v22 }
 0x14f   : > { %v916_v26 = vpop.f32.mrf.mxu0 }
 0x150   : > { %v509_v27 = vsel %vm507_vm1, %v502_v24, 0 }
 0x151   : > { %921 = vmatpush3.bf16.msra.mxu1 %v509_v27 }
 0x152   : > { %657 = vmatprep.subr.bf16.mxu1 %v1056_v25 }
 0x154   : > { %923 = vmatmul.mubr.msk.bf16.vlgmr.msra.gmra.mxu1 %vm503_vm2, %v501_v28 }
 0x155   : > { %658 = vmatpush1.bf16.msra.mxu1 %v1054_v29  ;;  %689 = vmatprep.mubr.bf16.mxu1 %v1311_v44 }
 0x156   : > { %659 = vmatprep.subr.bf16.mxu1 %v1059_v30 }
 0x159   : > { %660 = vmatpush1.bf16.msra.mxu1 %v1057_v31 }
 0x15a   : > { %661 = vmatprep.subr.bf16.mxu1 %v1062_v32 }
 0x15d   : > { %662 = vmatpush1.bf16.msra.mxu1 %v1060_v33 }
 0x15e   : > { %663 = vmatprep.subr.bf16.mxu1 %v1065_v34 }
 0x161   : > { %664 = vmatpush1.bf16.msra.mxu1 %v1063_v35 }
 0x162   : > { %665 = vmatprep.subr.bf16.mxu1 %v1068_v36 }
 0x165   : > { %666 = vmatpush1.bf16.msra.mxu1 %v1066_v37 }
 0x166   : > { %667 = vmatprep.subr.bf16.mxu1 %v1071_v38 }
 0x169   : > { %668 = vmatpush1.bf16.msra.mxu1 %v1069_v39 }
 0x16a   : > { %669 = vmatprep.subr.bf16.mxu1 %v1074_v40 }
 0x16d   : > { %670 = vmatpush1.bf16.msra.mxu1 %v1072_v41 }
 0x16e   : > { %671 = vmatprep.subr.bf16.mxu1 %v1077_v42 }
 0x171   : > { %672 = vmatpush1.bf16.msra.mxu1 %v1075_v43 }
 0x214   : > { %v545_v46 = vpop.f32.mrf.mxu1 }
 0x215   : > { %v558_v47 = vadd.f32 %v557_v45, %v545_v46 }
 0x216   : > { %v924_v48 = vpop.f32.mrf.mxu1 }
 0x217   : > { %v559_v49 = vmax.f32 %v558_v47, 0.0 }
 0x218   : > { %v548_v50 = vpop.f32.mrf.mxu1 }
 0x219   : > { %v560_v51 = vpack.c.bf16 %v559_v49, %v559_v49 }
 0x21a   : > { %v925_v52 = vpop.f32.mrf.mxu1 }
 0x21b   : > { %690 = vmatmul.mubr.bf16.vlgmr.msra.gmra.mxu1 %v560_v51 }
 0x2db   : > { %v691_v53 = vpop.f32.mrf.mxu1 }
 0x2dc   : > { %698 = vst [vmem:[%s317_s25] sm:$0xff] %v691_v53 }
 0x2dd   : > { %v693_v54 = vpop.f32.mrf.mxu1 }
 0x2de   : > { %699 = vst [vmem:[%s317_s25 + $0x8] sm:$0xff] %v693_v54 }
 0x2df   : > { %v695_v55 = vpop.f32.mrf.mxu1 }
 0x2e0   : > { %1223 = shalt.err (!%p1220_p5)
}
 0x2e1   : > { %s1224_s14 = scalar_lea.hbm %s1506_s8, 256  ;;  %s1228_s1 = scalar_lea.hbm %s1557_s5, 512 }
 0x2e2   : > { %p1225_p6 = scmp.ne.s32.totalorder %s1506_s8, %s1224_s14  ;;  %p1229_p4 = scmp.lt.s32.totalorder %s1506_s8, %s1557_s5 }
 0x2e3   : > { %p1230_p3 = scmp.lt.s32.totalorder %s1228_s1, %s1224_s14 }
 0x2e4   : > { %p1226_p8 = pnand %p1225_p6, %p1453_p11 }
 0x2e5   : > { %p1231_p1 = por %p1230_p3, %p1229_p4 }
 0x2e6   : > { %p1227_p10 = pneg %p1226_p8 }
 0x2e8   : > { %p1232_p9 = pnand %p1231_p1, %p1227_p10 }
 0x2ea   : > { %1235 = shalt.err (!%p1232_p9)
}
 0x2eb   : > { %944 = dma.vmem_to_hbm [thread:$0]  (%p1453_p11), %s1501_s26, 256, %s1506_s8, %s701_s10   ;;  %v696_v56 = vpop.f32.mrf.mxu1 }
 0x2ec PF: > { %s727_s2 = sand.u32 1, %s1278_s18   ;;  %p1572_p13 = scmp.ge.s32.totalorder %s1298_s23, 2 }
 0x2ed   : > { %s728_s25 = scalar_lea.sflag [#allocation5], %s727_s2 }
 0x2ee   : > { %p964_p7 = pnand %p1572_p13, %p1460_p12 }
 0x2f0   : > { %p965_p0 = pneg %p964_p7 }
 0x2f2   : > { %1273 = dma.done.wait (%p965_p0), %s728_s25, 256  }
 0x2f3   : > { %1275 = vsyncadd (%p965_p0), %s728_s25, 4294967040  ;;  %s23_s23 = sadd.s32 1, %s1298_s23   ;;  %s1573_s18 = smov %s1282_s19 }
 0x2f4   : > { %p20_p2 = scmp.ge.s32.totalorder %s23_s23, 4   ;;  %s1574_s19 = smov %s1286_s20 }
 0x2f5   : > { %s1575_s20 = smov %s1458_s27  ;;  %s1576_s21 = smov %s1294_s22 }
 0x2f6   : > { %s1577_s22 = smov %s1579_s13  ;;  %22 = sbr.rel (!%p20_p2) target bundleno = 11 (0xb), region = 110 }
 0x2fb   :  { %733 = vsyncpa [#allocation4], 1 }
 0x2fc   :  { %735 = vsyncpa [#allocation4 + $0x1], 1 }
 0x2fd   :  { %736 = vsyncpa [#allocation7], 1 }
 0x2fe   :  { %737 = vsyncpa [#allocation10], 1 }
 0x2ff   :  { %738 = vsyncpa [#allocation5], 1 }
 0x300   :  { %740 = vsyncpa [#allocation5 + $0x1], 1 }

</bundles_post_ra>
